<compile_context>
chip_gen: v5e
topology: v5e:2x2
jax: 0.10.0
libtpu: 0.0.40
codegen_flags: <defaults>
</compile_context>

<pallas_src>
import functools

import jax
import jax.numpy as jnp
from jax.experimental import pallas as pl
from jax.experimental.pallas import tpu as pltpu


def _round_up(n: int, m: int) -> int:
    return ((n + m - 1) // m) * m


def dqnn_kernel(x_ref, w1_ref, b1_ref, w2_ref, b2_ref, w3_ref, b3_ref, out_ref):
    """Fused fc1->ReLU->fc2->ReLU->fc3 on one (features, batch) tile.

    x_ref:   (D,   TB) bf16   activations, batch on the 128-lane axis
    w*_ref:  (out, in) bf16   PyTorch-layout weights (out dims zero-padded to multiples of 8)
    b*_ref:  (out, 1)  f32
    out_ref: (A_p, TB) f32
    """
    x = x_ref[...]
    # fc1 + ReLU: bf16 MXU matmul, f32 accumulate; bias/ReLU on the f32 accumulator.
    h1 = jnp.dot(w1_ref[...], x, preferred_element_type=jnp.float32)
    h1 = jnp.maximum(h1 + b1_ref[...], 0.0)
    # fc2 + ReLU.
    h2 = jnp.dot(w2_ref[...], h1.astype(w2_ref.dtype), preferred_element_type=jnp.float32)
    h2 = jnp.maximum(h2 + b2_ref[...], 0.0)
    # fc3 (no activation); dense lane-major store.
    out = jnp.dot(w3_ref[...], h2.astype(w3_ref.dtype), preferred_element_type=jnp.float32)
    out_ref[...] = (out + b3_ref[...]).astype(out_ref.dtype)


def prepare_params(w1, b1, w2, b2, w3, b3):
    """One-time conversion of PyTorch-layout params into the kernel layout.

    Inputs:  w*: (out_features, in_features), b*: (out_features,)  (float32).
    Returns: (w1p, b1p, w2p, b2p, w3p, b3p): bf16 weights (out_pad, in_pad), f32 biases
             (out_pad, 1); out dims zero-padded to multiples of 8, each layer's in dim padded to
             match the previous layer's padded out dim (zero rows stay exactly 0 through ReLU).
    Call once per weight update, NOT per forward pass — this hoists all padding/cast ops off the
    latency-critical action-selection path.
    """
    def prep(w, b, in_pad):
        out_f, in_f = w.shape
        out_p = _round_up(out_f, 8)
        wp = jnp.zeros((out_p, in_pad), jnp.bfloat16).at[:out_f, :in_f].set(
            w.astype(jnp.bfloat16))
        bp = jnp.zeros((out_p, 1), jnp.float32).at[:out_f, :].set(
            b.astype(jnp.float32).reshape(out_f, 1))
        return wp, bp

    w1p, b1p = prep(w1, b1, w1.shape[1])
    w2p, b2p = prep(w2, b2, w1p.shape[0])
    w3p, b3p = prep(w3, b3, w2p.shape[0])
    return (w1p, b1p, w2p, b2p, w3p, b3p)


@functools.partial(jax.jit, static_argnames=("n_actions", "tile_b"))
def dqnn_forward(x, params, *, n_actions=None, tile_b=None):
    """Fused 3-layer MLP forward: x (B, input_dims) f32 -> (B, n_actions) f32."""
    w1p, b1p, w2p, b2p, w3p, b3p = params
    B, D = x.shape
    assert D == w1p.shape[1], "x feature dim must match fc1 in_features"
    H1 = w1p.shape[0]
    H2 = w2p.shape[0]
    Ap = w3p.shape[0]
    if n_actions is None:
        n_actions = Ap

    # Batch tiling (batch is the lane axis):
    #  * B <= 256: one grid step, block == full array -> no batch padding at all.
    #  * B  > 256: >= 2 lane-aligned (multiple-of-128) tiles, capped at 2048, so per-step
    #    overhead is amortized and v7x's two TensorCores can split the batch.
    if tile_b is None:
        if B <= 256:
            tile_b = B
        else:
            tile_b = min(2048, _round_up(pl.cdiv(B, 2), 128))
    if tile_b != B:
        tile_b = max(128, _round_up(tile_b, 128))
    B_pad = _round_up(B, tile_b)
    grid = (B_pad // tile_b,)

    # Feature-major activations: x -> (D, B_pad) bf16.  Zero-padded batch columns are wasted
    # lanes only (sliced off below).  This (and the tiny output slice/transpose) are the only
    # per-call XLA ops besides the pallas_call itself.
    x_t = x.T.astype(jnp.bfloat16)
    if B_pad != B:
        x_t = jnp.pad(x_t, ((0, 0), (0, B_pad - B)))

    const = lambda i: (0, 0)
    in_specs = [
        pl.BlockSpec((D, tile_b), lambda i: (0, i)),  # x, tiled over batch lanes
        pl.BlockSpec((H1, D), const),                 # w1  (constant index_map -> VMEM-resident)
        pl.BlockSpec((H1, 1), const),                 # b1
        pl.BlockSpec((H2, H1), const),                # w2
        pl.BlockSpec((H2, 1), const),                 # b2
        pl.BlockSpec((Ap, H2), const),                # w3
        pl.BlockSpec((Ap, 1), const),                 # b3
    ]
    out_specs = pl.BlockSpec((Ap, tile_b), lambda i: (0, i))

    out_t = pl.pallas_call(
        dqnn_kernel,
        out_shape=jax.ShapeDtypeStruct((Ap, B_pad), jnp.float32),
        grid=grid,
        in_specs=in_specs,
        out_specs=out_specs,
        compiler_params=pltpu.CompilerParams(
            dimension_semantics=("parallel",),
        ),
    )(x_t, w1p, b1p, w2p, b2p, w3p, b3p)

    # (Ap, B_pad) -> (B, n_actions); tiny slice + transpose.
    return out_t[:n_actions, :B].T


def init_linear_params(key, in_features, out_features):
    """Deterministic init mimicking torch.nn.Linear defaults (uniform +-1/sqrt(fan_in)).
    PyTorch layout: W (out_features, in_features), b (out_features,)."""
    kw, kb = jax.random.split(key)
    bound = 1.0 / jnp.sqrt(jnp.float32(in_features))
    w = jax.random.uniform(kw, (out_features, in_features), jnp.float32, -bound, bound)
    b = jax.random.uniform(kb, (out_features,), jnp.float32, -bound, bound)
    return w, b


def _ref_f32(x, w1, b1, w2, b2, w3, b3):
    """PyTorch-semantics f32 reference."""
    h1 = jnp.maximum(x @ w1.T + b1, 0.0)
    h2 = jnp.maximum(h1 @ w2.T + b2, 0.0)
    return h2 @ w3.T + b3


def _ref_bf16_path(x, w1, b1, w2, b2, w3, b3):
    """Pure-JAX reference matching the kernel's bf16-operand / f32-accumulate numerics."""
    bf16, f32 = jnp.bfloat16, jnp.float32
    h1 = jnp.dot(x.astype(bf16), w1.astype(bf16).T, preferred_element_type=f32) + b1
    h1 = jnp.maximum(h1, 0.0)
    h2 = jnp.dot(h1.astype(bf16), w2.astype(bf16).T, preferred_element_type=f32) + b2
    h2 = jnp.maximum(h2, 0.0)
    return jnp.dot(h2.astype(bf16), w3.astype(bf16).T, preferred_element_type=f32) + b3


if __name__ == "__main__":
    # Shapes consistent with DQNN(lr, input_dims=8, fc1_neurons=128, fc2_neurons=64, ..., n_actions=4)
    input_dims = 8
    fc1_neurons = 128
    fc2_neurons = 64
    n_actions = 4

    key = jax.random.PRNGKey(0)
    kx, k1, k2, k3 = jax.random.split(key, 4)

    w1, b1 = init_linear_params(k1, input_dims, fc1_neurons)
    w2, b2 = init_linear_params(k2, fc1_neurons, fc2_neurons)
    w3, b3 = init_linear_params(k3, fc2_neurons, n_actions)

    # One-time parameter prep (hoisted off the per-call path).
    params = prepare_params(w1, b1, w2, b2, w3, b3)

    # 1) Inference-style small batch: grid of 1 full-array block, no padding anywhere.
    batch = 8
    x = jax.random.normal(kx, (batch, input_dims), jnp.float32)
    q = jax.block_until_ready(dqnn_forward(x, params, n_actions=n_actions))
    assert q.shape == (batch, n_actions)
    assert jnp.allclose(q, _ref_bf16_path(x, w1, b1, w2, b2, w3, b3), atol=2e-3, rtol=2e-3)
    assert jnp.allclose(q, _ref_f32(x, w1, b1, w2, b2, w3, b3), atol=5e-2, rtol=5e-2)

    # 2) Replay-style batch on the default tiling (B > 256 -> two 256-lane tiles; exercises
    #    batch padding and the "parallel" grid axis that v7x megacore can shard).
    big_batch = 300
    xb = jax.random.normal(jax.random.PRNGKey(1), (big_batch, input_dims), jnp.float32)
    qb = jax.block_until_ready(dqnn_forward(xb, params, n_actions=n_actions))
    assert qb.shape == (big_batch, n_actions)
    assert jnp.allclose(qb, _ref_bf16_path(xb, w1, b1, w2, b2, w3, b3), atol=2e-3, rtol=2e-3)

    # 3) Explicit tile size (rounded to 128 lanes -> grid of 3 steps); must match the default run.
    qb3 = jax.block_until_ready(dqnn_forward(xb, params, n_actions=n_actions, tile_b=128))
    assert qb3.shape == (big_batch, n_actions)
    assert jnp.allclose(qb3, qb, atol=1e-5, rtol=1e-5)

    # TODO(synk): optimizer (Adam), MSELoss and epsilon bookkeeping are training-side state of the
    # torch module, not part of forward(); they are intentionally not implemented as kernels.
    print("KERNEL_OK")
</pallas_src>

<mosaic_0001>
module attributes {stable_mosaic.version = 11 : i64} {
  func.func @dqnn_kernel(%arg0: i32, %arg1: memref<8x8xbf16, #tpu.memory_space<vmem>>, %arg2: memref<128x8xbf16, #tpu.memory_space<vmem>>, %arg3: memref<128x1xf32, #tpu.memory_space<vmem>>, %arg4: memref<64x128xbf16, #tpu.memory_space<vmem>>, %arg5: memref<64x1xf32, #tpu.memory_space<vmem>>, %arg6: memref<8x64xbf16, #tpu.memory_space<vmem>>, %arg7: memref<8x1xf32, #tpu.memory_space<vmem>>, %arg8: memref<8x8xf32, #tpu.memory_space<vmem>>) attributes {dimension_semantics = [#tpu.dimension_semantics<parallel>], iteration_bounds = array<i64: 1>, scalar_prefetch = 0 : i64, scratch_operands = 0 : i64, tpu.core_type = #tpu.core_type<tc>, window_params = [{transform_indices = @transform_0, window_bounds = array<i64: 8, 8>}, {pipeline_mode = #tpu.pipeline_mode<synchronous>, transform_indices = @transform_1, window_bounds = array<i64: 128, 8>}, {pipeline_mode = #tpu.pipeline_mode<synchronous>, transform_indices = @transform_2, window_bounds = array<i64: 128, 1>}, {pipeline_mode = #tpu.pipeline_mode<synchronous>, transform_indices = @transform_3, window_bounds = array<i64: 64, 128>}, {pipeline_mode = #tpu.pipeline_mode<synchronous>, transform_indices = @transform_4, window_bounds = array<i64: 64, 1>}, {pipeline_mode = #tpu.pipeline_mode<synchronous>, transform_indices = @transform_5, window_bounds = array<i64: 8, 64>}, {pipeline_mode = #tpu.pipeline_mode<synchronous>, transform_indices = @transform_6, window_bounds = array<i64: 8, 1>}, {transform_indices = @transform_7, window_bounds = array<i64: 8, 8>}]} {
    %c0 = arith.constant 0 : index
    %c0_0 = arith.constant 0 : index
    %0 = vector.load %arg1[%c0, %c0_0] : memref<8x8xbf16, #tpu.memory_space<vmem>>, vector<8x8xbf16>
    %c0_1 = arith.constant 0 : index
    %c0_2 = arith.constant 0 : index
    %1 = vector.load %arg2[%c0_1, %c0_2] : memref<128x8xbf16, #tpu.memory_space<vmem>>, vector<128x8xbf16>
    %cst = arith.constant dense<0.000000e+00> : vector<128x8xf32>
    %2 = tpu.matmul %1, %0, %cst {dimension_numbers = #tpu.dot_dimension_numbers<[1], [0], [0], [1], [0, 0, 1, 1], [], []>} : vector<128x8xbf16>, vector<8x8xbf16>, vector<128x8xf32> -> vector<128x8xf32>
    %c0_3 = arith.constant 0 : index
    %c0_4 = arith.constant 0 : index
    %3 = vector.load %arg3[%c0_3, %c0_4] : memref<128x1xf32, #tpu.memory_space<vmem>>, vector<128x1xf32>
    %4 = vector.broadcast %3 : vector<128x1xf32> to vector<128x8xf32>
    %5 = arith.addf %2, %4 : vector<128x8xf32>
    %cst_5 = arith.constant 0.000000e+00 : f32
    %6 = vector.broadcast %cst_5 : f32 to vector<128x8xf32>
    %7 = arith.maximumf %5, %6 : vector<128x8xf32>
    %c0_6 = arith.constant 0 : index
    %c0_7 = arith.constant 0 : index
    %8 = vector.load %arg4[%c0_6, %c0_7] : memref<64x128xbf16, #tpu.memory_space<vmem>>, vector<64x128xbf16>
    %9 = arith.truncf %7 : vector<128x8xf32> to vector<128x8xbf16>
    %cst_8 = arith.constant dense<0.000000e+00> : vector<64x8xf32>
    %10 = tpu.matmul %8, %9, %cst_8 {dimension_numbers = #tpu.dot_dimension_numbers<[1], [0], [0], [1], [0, 0, 1, 1], [], []>} : vector<64x128xbf16>, vector<128x8xbf16>, vector<64x8xf32> -> vector<64x8xf32>
    %c0_9 = arith.constant 0 : index
    %c0_10 = arith.constant 0 : index
    %11 = vector.load %arg5[%c0_9, %c0_10] : memref<64x1xf32, #tpu.memory_space<vmem>>, vector<64x1xf32>
    %12 = vector.broadcast %11 : vector<64x1xf32> to vector<64x8xf32>
    %13 = arith.addf %10, %12 : vector<64x8xf32>
    %cst_11 = arith.constant 0.000000e+00 : f32
    %14 = vector.broadcast %cst_11 : f32 to vector<64x8xf32>
    %15 = arith.maximumf %13, %14 : vector<64x8xf32>
    %c0_12 = arith.constant 0 : index
    %c0_13 = arith.constant 0 : index
    %16 = vector.load %arg6[%c0_12, %c0_13] : memref<8x64xbf16, #tpu.memory_space<vmem>>, vector<8x64xbf16>
    %17 = arith.truncf %15 : vector<64x8xf32> to vector<64x8xbf16>
    %cst_14 = arith.constant dense<0.000000e+00> : vector<8x8xf32>
    %18 = tpu.matmul %16, %17, %cst_14 {dimension_numbers = #tpu.dot_dimension_numbers<[1], [0], [0], [1], [0, 0, 1, 1], [], []>} : vector<8x64xbf16>, vector<64x8xbf16>, vector<8x8xf32> -> vector<8x8xf32>
    %c0_15 = arith.constant 0 : index
    %c0_16 = arith.constant 0 : index
    %19 = vector.load %arg7[%c0_15, %c0_16] : memref<8x1xf32, #tpu.memory_space<vmem>>, vector<8x1xf32>
    %20 = vector.broadcast %19 : vector<8x1xf32> to vector<8x8xf32>
    %21 = arith.addf %18, %20 : vector<8x8xf32>
    %c0_17 = arith.constant 0 : index
    %c0_18 = arith.constant 0 : index
    %22 = vector.load %arg8[%c0_17, %c0_18] : memref<8x8xf32, #tpu.memory_space<vmem>>, vector<8x8xf32>
    tpu.vector_store %arg8[%c0_17, %c0_18], %21 {strides = array<i32>} : memref<8x8xf32, #tpu.memory_space<vmem>>, vector<8x8xf32>,
    return
  }
  func.func @transform_0(%arg0: i32) -> (i32, i32) {
    %c0_i32 = arith.constant 0 : i32
    %c0_i32_0 = arith.constant 0 : i32
    return %c0_i32, %arg0 : i32, i32
  }
  func.func @transform_1(%arg0: i32) -> (i32, i32) {
    %c0_i32 = arith.constant 0 : i32
    %c0_i32_0 = arith.constant 0 : i32
    %c0_i32_1 = arith.constant 0 : i32
    return %c0_i32, %c0_i32_0 : i32, i32
  }
  func.func @transform_2(%arg0: i32) -> (i32, i32) {
    %c0_i32 = arith.constant 0 : i32
    %c0_i32_0 = arith.constant 0 : i32
    %c0_i32_1 = arith.constant 0 : i32
    return %c0_i32, %c0_i32_0 : i32, i32
  }
  func.func @transform_3(%arg0: i32) -> (i32, i32) {
    %c0_i32 = arith.constant 0 : i32
    %c0_i32_0 = arith.constant 0 : i32
    %c0_i32_1 = arith.constant 0 : i32
    return %c0_i32, %c0_i32_0 : i32, i32
  }
  func.func @transform_4(%arg0: i32) -> (i32, i32) {
    %c0_i32 = arith.constant 0 : i32
    %c0_i32_0 = arith.constant 0 : i32
    %c0_i32_1 = arith.constant 0 : i32
    return %c0_i32, %c0_i32_0 : i32, i32
  }
  func.func @transform_5(%arg0: i32) -> (i32, i32) {
    %c0_i32 = arith.constant 0 : i32
    %c0_i32_0 = arith.constant 0 : i32
    %c0_i32_1 = arith.constant 0 : i32
    return %c0_i32, %c0_i32_0 : i32, i32
  }
  func.func @transform_6(%arg0: i32) -> (i32, i32) {
    %c0_i32 = arith.constant 0 : i32
    %c0_i32_0 = arith.constant 0 : i32
    %c0_i32_1 = arith.constant 0 : i32
    return %c0_i32, %c0_i32_0 : i32, i32
  }
  func.func @transform_7(%arg0: i32) -> (i32, i32) {
    %c0_i32 = arith.constant 0 : i32
    %c0_i32_0 = arith.constant 0 : i32
    return %c0_i32, %arg0 : i32, i32
  }
}

</mosaic_0001>

<bundles_post_ra>
// kernel: dqnn_forward.1
= control target key start
LH: loop header
LB: loop body
LE: loop exit
PB: predicated region body
PF: predicated region fallthrough
CT: control target
= control target key end

     0   :  { %vm205_vm0 = vcmask 1043456   ;;  %v514_v0 = vmov 0   ;;  %vm180_vm1 = vcmask 64512   ;;  %vm410_vm2 = vcmask 523264   ;;  %s690_s2 = inlined_call_operand.vmem [shape: f32[128,1], index: 2, kind: input, shape index: {}]   ;;  %s691_s0 = inlined_call_operand.vmem [shape: bf16[8,8], index: 0, kind: input, shape index: {}]   ;;  %s692_s1 = inlined_call_operand.vmem [shape: bf16[128,8], index: 1, kind: input, shape index: {}]   ;;  %s693_s4 = inlined_call_operand.vmem [shape: f32[64,1], index: 4, kind: input, shape index: {}]   ;;  %s694_s6 = inlined_call_operand.vmem [shape: f32[8,1], index: 6, kind: input, shape index: {}]   ;;  %s695_s3 = inlined_call_operand.vmem [shape: bf16[64,128], index: 3, kind: input, shape index: {}]   ;;  %s696_s5 = inlined_call_operand.vmem [shape: bf16[8,64], index: 5, kind: input, shape index: {}]   ;;  %s697_s7 = inlined_call_operand.vmem [shape: f32[8,8], index: 7, kind: output, shape index: {}]  }
   0x1   :  { %511 = vset.pattern.permute.xlu0 %v514_v0  ;;  %v58_v1 = vld [vmem:[%s690_s2 + $0x70] sm:$0xff]  ;;  %v27_v2 = vld [vmem:[%s691_s0] sm:$0xf]  ;;  %512 = vset.pattern.permute.xlu1 %v514_v0  ;;  %v59_v8 = vld [vmem:[%s690_s2 + $0x78] sm:$0xff] }
   0x2   :  { %132 = vperm.xlu0 %511, %v58_v1   ;;  %v207_v3 = vsel %vm205_vm0, %v27_v2, 0  ;;  %v489_v4 = vld [vmem:[%s692_s1] sm:$0xff]  ;;  %513 = vset.pattern.permute.xlu2 %v514_v0  ;;  %v54_v7 = vld [vmem:[%s690_s2 + $0x50] sm:$0xff]  ;;  %v57_v9 = vld [vmem:[%s690_s2 + $0x68] sm:$0xff] }
   0x3   :  { %v493_v5 = vld [vmem:[%s692_s1 + $0x20] sm:$0xff]  ;;  %216 = vmatpush.bf16.msra.mxu0 %v207_v3  ;;  %501 = vmatpush.bf16.msra.mxu3 %v207_v3  ;;  %v55_v10 = vld [vmem:[%s690_s2 + $0x58] sm:$0xff]  ;;  %v53_v12 = vld [vmem:[%s690_s2 + $0x48] sm:$0xff] }
   0x4   :  { %v56_v6 = vld [vmem:[%s690_s2 + $0x60] sm:$0xff]  ;;  %112 = vperm.xlu2 %513, %v54_v7   ;;  %v490_v13 = vld [vmem:[%s692_s1 + $0x8] sm:$0xff]  ;;  %v50_v15 = vld [vmem:[%s690_s2 + $0x30] sm:$0xff] }
   0x5   :  { %122 = vperm.xlu1 %512, %v56_v6   ;;  %v52_v11 = vld [vmem:[%s690_s2 + $0x40] sm:$0xff]  ;;  %v494_v14 = vld [vmem:[%s692_s1 + $0x28] sm:$0xff]  ;;  %v51_v16 = vld [vmem:[%s690_s2 + $0x38] sm:$0xff] }
   0x6   :  { %464 = vmatmul.msk.bf16.vlgmr.msra.gmra.mxu0 %vm180_vm1, %v489_v4  ;;  %468 = vmatmul.msk.bf16.vlgmr.msra.gmra.mxu3 %vm180_vm1, %v493_v5  ;;  %v48_v17 = vld [vmem:[%s690_s2 + $0x20] sm:$0xff]  ;;  %v49_v18 = vld [vmem:[%s690_s2 + $0x28] sm:$0xff]  ;;  %v46_v19 = vld [vmem:[%s690_s2 + $0x10] sm:$0xff] }
   0x7   :  { %v47_v20 = vld [vmem:[%s690_s2 + $0x18] sm:$0xff]  ;;  %v491_v21 = vld [vmem:[%s692_s1 + $0x10] sm:$0xff]  ;;  %v44_v23 = vld [vmem:[%s690_s2] sm:$0xff] }
   0x8   :  { %v495_v22 = vld [vmem:[%s692_s1 + $0x30] sm:$0xff]  ;;  %v45_v24 = vld [vmem:[%s690_s2 + $0x8] sm:$0xff]  ;;  %v297_v26 = vld [vmem:[%s693_s4 + $0x38] sm:$0xff] }
   0x9   :  { %v296_v25 = vld [vmem:[%s693_s4 + $0x30] sm:$0xff]  ;;  %v294_v27 = vld [vmem:[%s693_s4 + $0x20] sm:$0xff]  ;;  %v295_v28 = vld [vmem:[%s693_s4 + $0x28] sm:$0xff] }
   0xa   :  { %137 = vperm.xlu0 %511, %v59_v8   ;;  %v492_v29 = vld [vmem:[%s692_s1 + $0x18] sm:$0xff]  ;;  %v292_v31 = vld [vmem:[%s693_s4 + $0x10] sm:$0xff]  ;;  %v290_v33 = vld [vmem:[%s693_s4] sm:$0xff] }
   0xb   :  { %v496_v30 = vld [vmem:[%s692_s1 + $0x38] sm:$0xff]  ;;  %v291_v34 = vld [vmem:[%s693_s4 + $0x8] sm:$0xff]  ;;  %v404_v35 = vld [vmem:[%s694_s6] sm:$0xff] }
   0xc   :  { %117 = vperm.xlu2 %513, %v55_v10   ;;  %v293_v32 = vld [vmem:[%s693_s4 + $0x18] sm:$0xff] }
   0xd   :  { %127 = vperm.xlu1 %512, %v57_v9  }
  0x12   :  { %102 = vperm.xlu0 %511, %v52_v11  }
  0x14   :  { %92 = vperm.xlu2 %513, %v50_v15  }
  0x15   :  { %107 = vperm.xlu1 %512, %v53_v12  }
  0x16   :  { %465 = vmatmul.msk.bf16.gmra.mxu0 %vm180_vm1, %v490_v13  ;;  %469 = vmatmul.msk.bf16.gmra.mxu3 %vm180_vm1, %v494_v14 }
  0x1a   :  { %97 = vperm.xlu0 %511, %v51_v16  }
  0x1c   :  { %87 = vperm.xlu2 %513, %v49_v18  }
  0x1d   :  { %82 = vperm.xlu1 %512, %v48_v17  }
  0x22   :  { %72 = vperm.xlu0 %511, %v46_v19  }
  0x24   :  { %62 = vperm.xlu2 %513, %v44_v23  }
  0x25   :  { %77 = vperm.xlu1 %512, %v47_v20  }
  0x26   :  { %466 = vmatmul.msk.bf16.gmra.mxu0 %vm180_vm1, %v491_v21  ;;  %470 = vmatmul.msk.bf16.gmra.mxu3 %vm180_vm1, %v495_v22 }
  0x2a   :  { %67 = vperm.xlu0 %511, %v45_v24  }
  0x2c   :  { %335 = vperm.xlu2 %513, %v297_v26  }
  0x2d   :  { %330 = vperm.xlu1 %512, %v296_v25  }
  0x32   :  { %320 = vperm.xlu0 %511, %v294_v27  }
  0x34   :  { %310 = vperm.xlu2 %513, %v292_v31  }
  0x35   :  { %325 = vperm.xlu1 %512, %v295_v28  }
  0x36   :  { %467 = vmatmul.msk.bf16.gmra.mxu0 %vm180_vm1, %v492_v29  ;;  %471 = vmatmul.msk.bf16.gmra.mxu3 %vm180_vm1, %v496_v30 }
  0x3a   :  { %315 = vperm.xlu0 %511, %v293_v32  }
  0x3c   :  { %305 = vperm.xlu2 %513, %v291_v34  }
  0x3d   :  { %300 = vperm.xlu1 %512, %v290_v33  }
  0x42   :  { %407 = vperm.xlu0 %511, %v404_v35  }
  0x5e   :  { %v113_v49 = vpop.permute.xlu2 %112 }
  0x66   :  { %v118_v55 = vpop.permute.xlu2 %117 }
  0x6e   :  { %v93_v2 = vpop.permute.xlu2 %92 }
  0x74   :  { %v133_v44 = vpop.permute.xlu0 %132 }
  0x76   :  { %v88_v21 = vpop.permute.xlu2 %87 }
  0x77   :  { %v123_v46 = vpop.permute.xlu1 %122 }
  0x7c   :  { %v138_v48 = vpop.permute.xlu0 %137 }
  0x7e   :  { %v63_v34 = vpop.permute.xlu2 %62 }
  0x7f   :  { %v128_v51 = vpop.permute.xlu1 %127 }
  0x83   :  { %v665_v36 = vpop.f32.mrf.mxu0 }
  0x84   :  { %v103_v53 = vpop.permute.xlu0 %102 }
  0x87   :  { %v108_v56 = vpop.permute.xlu1 %107 }
  0x89   :  { %v238_v37 = vpop.f32.mrf.mxu3 }
  0x8a   :  { %v239_v11 = vadd.f32 %v238_v37, %v103_v53  ;;  %v336_v53 = vpop.permute.xlu2 %335 }
  0x8b   :  { %v667_v38 = vpop.f32.mrf.mxu0 }
  0x8c   :  { %v98_v62 = vpop.permute.xlu0 %97  ;;  %v266_v20 = vmax.f32 %v239_v11, 0.0 }
  0x8f   :  { %v83_v12 = vpop.permute.xlu1 %82 }
  0x91   :  { %v240_v39 = vpop.f32.mrf.mxu3 }
  0x92   :  { %v241_v8 = vadd.f32 %v240_v39, %v108_v56 }
  0x93   :  { %v223_v40 = vpop.f32.mrf.mxu0 }
  0x94   :  { %v267_v15 = vmax.f32 %v241_v8, 0.0  ;;  %v73_v16 = vpop.permute.xlu0 %72 }
  0x95   :  { %v224_v27 = vadd.f32 %v223_v40, %v73_v16 }
  0x96   :  { %v286_v22 = vpack.c.bf16 %v267_v15, %v266_v20  ;;  %v399_v20 = vld [vmem:[%s696_s5] sm:$0xf] }
  0x97   :  { %v78_v28 = vpop.permute.xlu1 %77  ;;  %v260_v35 = vmax.f32 %v224_v27, 0.0 }
  0x99   :  { %v243_v41 = vpop.f32.mrf.mxu3 }
  0x9a   :  { %v244_v6 = vadd.f32 %v243_v41, %v113_v49 }
  0x9b   :  { %v225_v43 = vpop.f32.mrf.mxu0 }
  0x9c   :  { %v268_v14 = vmax.f32 %v244_v6, 0.0  ;;  %v226_v29 = vadd.f32 %v225_v43, %v78_v28  ;;  %v68_v33 = vpop.permute.xlu0 %67 }
  0x9d   :  { %v221_v37 = vadd.f32 %v667_v38, %v68_v33  ;;  %v500_v38 = vld [vmem:[%s695_s3 + $0x18] sm:$0xff] }
  0x9e   :  { %v261_v39 = vmax.f32 %v226_v29, 0.0 }
  0xa0   :  { %v283_v40 = vpack.c.bf16 %v261_v39, %v260_v35 }
  0xa1   :  { %v245_v42 = vpop.f32.mrf.mxu3 }
  0xa2   :  { %v246_v3 = vadd.f32 %v245_v42, %v118_v55  ;;  %v219_v42 = vadd.f32 %v665_v36, %v63_v34  ;;  %v498_v36 = vld [vmem:[%s695_s3 + $0x8] sm:$0xff] }
  0xa3   :  { %v228_v47 = vpop.f32.mrf.mxu0 }
  0xa4   :  { %v269_v9 = vmax.f32 %v246_v3, 0.0  ;;  %v229_v23 = vadd.f32 %v228_v47, %v83_v12  ;;  %v499_v47 = vld [vmem:[%s695_s3 + $0x10] sm:$0xff] }
  0xa6   :  { %v287_v19 = vpack.c.bf16 %v269_v9, %v268_v14  ;;  %v262_v30 = vmax.f32 %v229_v23, 0.0 }
  0xa9   :  { %v248_v45 = vpop.f32.mrf.mxu3 }
  0xaa   :  { %v249_v63 = vadd.f32 %v248_v45, %v123_v46  ;;  %v258_v45 = vmax.f32 %v219_v42, 0.0  ;;  %v497_v46 = vld [vmem:[%s695_s3] sm:$0xff] }
  0xab   :  { %v230_v52 = vpop.f32.mrf.mxu0 }
  0xac   :  { %v270_v7 = vmax.f32 %v249_v63, 0.0  ;;  %v231_v24 = vadd.f32 %v230_v52, %v88_v21  ;;  %v311_v63 = vpop.permute.xlu2 %310 }
  0xae   :  { %v263_v31 = vmax.f32 %v231_v24, 0.0 }
  0xb0   :  { %v284_v41 = vpack.c.bf16 %v263_v31, %v262_v30 }
  0xb1   :  { %v250_v50 = vpop.f32.mrf.mxu3 }
  0xb2   :  { %v251_v60 = vadd.f32 %v250_v50, %v128_v51  ;;  %v331_v51 = vpop.permute.xlu1 %330 }
  0xb3   :  { %v233_v58 = vpop.f32.mrf.mxu0 }
  0xb4   :  { %v271_v4 = vmax.f32 %v251_v60, 0.0  ;;  %v234_v17 = vadd.f32 %v233_v58, %v93_v2  ;;  %v306_v9 = vpop.permute.xlu2 %305 }
  0xb6   :  { %v288_v10 = vpack.c.bf16 %v271_v4, %v270_v7  ;;  %v264_v25 = vmax.f32 %v234_v17, 0.0 }
  0xb9   :  { %v253_v54 = vpop.f32.mrf.mxu3 }
  0xba   :  { %v254_v57 = vadd.f32 %v253_v54, %v133_v44  ;;  %v259_v44 = vmax.f32 %v221_v37, 0.0 }
  0xbb   :  { %v235_v13 = vpop.f32.mrf.mxu0 }
  0xbc   :  { %v272_v0 = vmax.f32 %v254_v57, 0.0  ;;  %v236_v18 = vadd.f32 %v235_v13, %v98_v62  ;;  %v282_v43 = vpack.c.bf16 %v259_v44, %v258_v45 }
  0xbe   :  { %v265_v26 = vmax.f32 %v236_v18, 0.0 }
  0xc0   :  { %v285_v32 = vpack.c.bf16 %v265_v26, %v264_v25 }
  0xc1   :  { %v255_v59 = vpop.f32.mrf.mxu3 }
  0xc2   :  { %v256_v61 = vadd.f32 %v255_v59, %v138_v48 }
  0xc4   :  { %v273_v1 = vmax.f32 %v256_v61, 0.0  ;;  %v321_v61 = vpop.permute.xlu0 %320 }
  0xc6   :  { %v289_v5 = vpack.c.bf16 %v273_v1, %v272_v0  ;;  %v326_v0 = vpop.permute.xlu1 %325 }
  0xc8   :  { %362 = vmatpush.bf16.msra.mxu1 %v289_v5  ;;  %502 = vmatpush.bf16.msra.mxu2 %v289_v5 }
  0xcc   :  { %363 = vmatpush.bf16.msra.mxu1 %v288_v10  ;;  %503 = vmatpush.bf16.msra.mxu2 %v288_v10  ;;  %v316_v2 = vpop.permute.xlu0 %315 }
  0xce   :  { %v301_v13 = vpop.permute.xlu1 %300 }
  0xd0   :  { %364 = vmatpush.bf16.msra.mxu1 %v287_v19  ;;  %504 = vmatpush.bf16.msra.mxu2 %v287_v19 }
  0xd4   :  { %365 = vmatpush.bf16.msra.mxu1 %v286_v22  ;;  %505 = vmatpush.bf16.msra.mxu2 %v286_v22  ;;  %v408_v21 = vpop.permute.xlu0 %407 }
  0xd8   :  { %366 = vmatpush.bf16.msra.mxu1 %v285_v32  ;;  %506 = vmatpush.bf16.msra.mxu2 %v285_v32 }
  0xdc   :  { %367 = vmatpush.bf16.msra.mxu1 %v284_v41  ;;  %507 = vmatpush.bf16.msra.mxu2 %v284_v41 }
  0xe0   :  { %368 = vmatpush.bf16.msra.mxu1 %v283_v40  ;;  %508 = vmatpush.bf16.msra.mxu2 %v283_v40 }
  0xe4   :  { %369 = vmatpush.bf16.msra.mxu1 %v282_v43  ;;  %509 = vmatpush.bf16.msra.mxu2 %v282_v43 }
  0xe7   :  { %370 = vmatmul.bf16.vlgmr.msra.gmra.mxu1 %v497_v46  ;;  %385 = vmatmul.bf16.vlgmr.msra.gmra.mxu2 %v500_v38 }
  0xf7   :  { %375 = vmatmul.bf16.gmra.mxu1 %v498_v36 }
 0x107   :  { %380 = vmatmul.bf16.gmra.mxu1 %v499_v47 }
 0x164   :  { %v371_v48 = vpop.f32.mrf.mxu1 }
 0x165   :  { %v372_v14 = vadd.f32 %v371_v48, %v301_v13 }
 0x167   :  { %v391_v18 = vmax.f32 %v372_v14, 0.0 }
 0x16a   :  { %v386_v49 = vpop.f32.mrf.mxu2 }
 0x16b   :  { %v387_v52 = vadd.f32 %v386_v49, %v331_v51 }
 0x16c   :  { %v373_v50 = vpop.f32.mrf.mxu1 }
 0x16d   :  { %v397_v57 = vmax.f32 %v387_v52, 0.0  ;;  %v374_v10 = vadd.f32 %v373_v50, %v306_v9 }
 0x16f   :  { %v392_v16 = vmax.f32 %v374_v10, 0.0 }
 0x171   :  { %v400_v19 = vpack.c.bf16 %v392_v16, %v391_v18 }
 0x172   :  { %v388_v54 = vpop.f32.mrf.mxu2 }
 0x173   :  { %v389_v55 = vadd.f32 %v388_v54, %v336_v53 }
 0x174   :  { %v376_v56 = vpop.f32.mrf.mxu1 }
 0x175   :  { %v398_v58 = vmax.f32 %v389_v55, 0.0  ;;  %v377_v6 = vadd.f32 %v376_v56, %v311_v63 }
 0x177   :  { %v403_v59 = vpack.c.bf16 %v398_v58, %v397_v57  ;;  %v393_v15 = vmax.f32 %v377_v6, 0.0 }
 0x179   :  { %418 = vmatpush.bf16.msrb.mxu2 %v403_v59 }
 0x17c   :  { %v378_v60 = vpop.f32.mrf.mxu1 }
 0x17d   :  { %v379_v4 = vadd.f32 %v378_v60, %v316_v2 }
 0x17f   :  { %v394_v11 = vmax.f32 %v379_v4, 0.0 }
 0x181   :  { %v401_v17 = vpack.c.bf16 %v394_v11, %v393_v15 }
 0x184   :  { %v381_v62 = vpop.f32.mrf.mxu1 }
 0x185   :  { %v382_v1 = vadd.f32 %v381_v62, %v321_v61 }
 0x187   :  { %v395_v7 = vmax.f32 %v382_v1, 0.0 }
 0x18c   :  { %v383_v3 = vpop.f32.mrf.mxu1 }
 0x18d   :  { %v384_v5 = vadd.f32 %v383_v3, %v326_v0 }
 0x18f   :  { %v396_v8 = vmax.f32 %v384_v5, 0.0 }
 0x191   :  { %v402_v12 = vpack.c.bf16 %v396_v8, %v395_v7 }
 0x193   :  { %419 = vmatpush.bf16.msrb.mxu2 %v402_v12 }
 0x197   :  { %420 = vmatpush.bf16.msrb.mxu2 %v401_v17 }
 0x19b   :  { %421 = vmatpush.bf16.msrb.mxu2 %v400_v19 }
 0x19e   :  { %488 = vmatmul.msk.bf16.vlgmr.msrb.gmra.mxu2 %vm410_vm2, %v399_v20 }
 0x221   :  { %v423_v22 = vpop.f32.mrf.mxu2 }
 0x222   :  { %v424_v23 = vadd.f32 %v423_v22, %v408_v21 }
 0x224   :  { %427 = vst.msk [vmem:[%s697_s7] sm:$0xff] %vm180_vm1, %v424_v23 }
 0x229   :  { %v425_v24 = vpop.f32.mrf.mxu2 }

</bundles_post_ra>
